<compile_context>
chip_gen: v7x
topology: tpu7x:2x2x1
jax: 0.10.0
libtpu: 0.0.40
codegen_flags: <defaults>
</compile_context>

<pallas_src>
import functools

import numpy as np

import jax
import jax.numpy as jnp
from jax.experimental import pallas as pl
from jax.experimental.pallas import tpu as pltpu

H1, H2, H3 = 256, 128, 64
_SUBLANE = 8
_MAX_TK = 2048          # largest K tile for layer 1
_MAX_TB = 4096          # largest batch tile we ever ask for


def _round_up(n, m):
    return (n + m - 1) // m * m


@functools.lru_cache(maxsize=None)
def _vmem_plan():
    """Generation-aware (budget_bytes, vmem_limit_bytes, two_cores)."""
    vmem = None
    try:
        info = pltpu.get_tpu_info()
        vmem = getattr(info, "vmem_capacity_bytes", None)
    except Exception:
        vmem = None
    if vmem is None:
        # Conservative default that fits every supported generation.
        return 32 * 1024 * 1024, 48 * 1024 * 1024, False
    two_cores = vmem <= 80 * 1024 * 1024          # v7x: 64 MiB per TC, 2 TCs
    if vmem >= 100 * 1024 * 1024:                 # v5e / v6e: 128 MiB physical
        budget, limit = 64 * 1024 * 1024, 96 * 1024 * 1024
    else:                                         # v7x
        budget, limit = 28 * 1024 * 1024, 44 * 1024 * 1024
    limit = min(limit, vmem * 3 // 4)
    budget = min(budget, max(limit - 8 * 1024 * 1024, limit // 2))
    return budget, limit, two_cores


def _pick_tiles(B, F, budget, two_cores, x_bytes, w_bytes, max_block_b):
    """Pick (tb, tk, nk, mask_tail) so pipelined VMEM stays within budget."""
    # --- K tile over the feature dim (layer-1 reduction). ---
    if F <= _MAX_TK:
        tk, mask_tail = F, False
    else:
        mask_tail = False
        for cand in (2048, 1024, 512):
            if F % cand == 0:
                tk = cand
                break
        else:
            tk, mask_tail = 1024, True            # ragged K tail masked in-kernel
    nk = pl.cdiv(F, tk)

    # --- Batch tile from the VMEM budget. ---
    w1_bufs = 1 if nk == 1 else 2                 # resident vs K-streamed
    fixed = (w1_bufs * tk * H1 + H1 * H2 + H2 * H3) * w_bytes \
            + (H1 + H2 + H3) * 4                  # biases stay f32
    per_row = 2 * tk * x_bytes                    # x tile, double-buffered
    per_row += 2 * H3 * 4                         # out tile, double-buffered (f32)
    per_row += (H1 * 4 if nk > 1 else 0)          # f32 accumulator scratch
    per_row += (H1 + H2) * 4                      # live h1 / h2 (f32)
    per_row += (tk + H1 + H2) * w_bytes           # MXU-dtype temporaries

    avail = max(budget - fixed, _SUBLANE * per_row)
    tb_cap = max(_SUBLANE, (avail // per_row) // _SUBLANE * _SUBLANE)

    tb = min(max_block_b, _round_up(B, _SUBLANE), tb_cap)
    if two_cores and B >= 2 * _SUBLANE:
        # v7x: keep nb >= 2 so both TensorCores get batch tiles.
        tb = min(tb, _round_up(pl.cdiv(B, 2), _SUBLANE))
    tb = max(_SUBLANE, (tb // _SUBLANE) * _SUBLANE)
    return tb, tk, nk, mask_tail


def _mlp_kernel_fused(x_ref, w1_ref, b1_ref, w2_ref, b2_ref, w3_ref, b3_ref,
                      o_ref, *, matmul_dtype):
    """nk == 1 fast path: whole F in one shot, no accumulator, no branches."""
    x = x_ref[...]
    if x.dtype != matmul_dtype:
        x = x.astype(matmul_dtype)
    w1, w2, w3 = w1_ref[...], w2_ref[...], w3_ref[...]

    h1 = jnp.dot(x, w1, preferred_element_type=jnp.float32) + b1_ref[...]
    h1 = jnp.maximum(h1, 0.0)
    h2 = jnp.dot(h1.astype(w2.dtype), w2,
                 preferred_element_type=jnp.float32) + b2_ref[...]
    h2 = jnp.maximum(h2, 0.0)
    h3 = jnp.dot(h2.astype(w3.dtype), w3,
                 preferred_element_type=jnp.float32) + b3_ref[...]
    h3 = jnp.maximum(h3, 0.0)
    # TODO(synk): H3=64 < 128 lanes means masked output stores; a lane-dense
    # (tb//2, 128) relayout could shave store-slot pressure on v5e.
    o_ref[...] = h3.astype(o_ref.dtype)


def _mlp_kernel_ktiled(x_ref, w1_ref, b1_ref, w2_ref, b2_ref, w3_ref, b3_ref,
                       o_ref, acc_ref, *, matmul_dtype, f_total, tk, mask_tail):
    """nk > 1 path: layer 1 K-tiled into acc_ref, layers 2/3 on the last step."""
    k = pl.program_id(1)
    x = x_ref[...]
    w1 = w1_ref[...]

    if mask_tail:
        # Ragged K tail: both the stale x columns and the stale w1 rows of the
        # partial last block are zeroed so they cannot pollute the accumulator.
        rem = f_total - k * tk
        col = jax.lax.broadcasted_iota(jnp.int32, x.shape, 1)
        x = jnp.where(col < rem, x, jnp.zeros_like(x))
        row = jax.lax.broadcasted_iota(jnp.int32, w1.shape, 0)
        w1 = jnp.where(row < rem, w1, jnp.zeros_like(w1))

    if x.dtype != matmul_dtype:
        x = x.astype(matmul_dtype)
    partial = jnp.dot(x, w1, preferred_element_type=jnp.float32)

    @pl.when(k == 0)
    def _store():                     # direct store, no zero-fill round trip
        acc_ref[...] = partial

    @pl.when(k > 0)
    def _accumulate():
        acc_ref[...] += partial

    @pl.when(k == pl.num_programs(1) - 1)
    def _finalize():
        w2, w3 = w2_ref[...], w3_ref[...]
        h1 = jnp.maximum(acc_ref[...] + b1_ref[...], 0.0)
        h2 = jnp.dot(h1.astype(w2.dtype), w2,
                     preferred_element_type=jnp.float32) + b2_ref[...]
        h2 = jnp.maximum(h2, 0.0)
        h3 = jnp.dot(h2.astype(w3.dtype), w3,
                     preferred_element_type=jnp.float32) + b3_ref[...]
        h3 = jnp.maximum(h3, 0.0)
        o_ref[...] = h3.astype(o_ref.dtype)


@functools.partial(jax.jit, static_argnames=("matmul_dtype", "max_block_b"))
def full_connected_layer(x, params, matmul_dtype=jnp.bfloat16,
                         max_block_b=_MAX_TB):
    """Forward pass of FullConnectedLayer.

    x: (B, F), f32 or bf16
    params: dict with w1 (F,256), w2 (256,128), w3 (128,64) stored (in, out)
            (y = x @ W + b), plus biases b1/b2/b3 of shape (1, H) or (H,).
    returns: (B, 64) float32
    """
    mm_dtype = np.dtype(matmul_dtype)

    # Weights should already be in the MXU dtype (use prepare_params once,
    # outside the hot loop); cast here only as a fallback.
    def _as_w(w):
        return w if w.dtype == mm_dtype else w.astype(mm_dtype)

    w1, w2, w3 = _as_w(params["w1"]), _as_w(params["w2"]), _as_w(params["w3"])
    b1 = params["b1"].astype(jnp.float32).reshape(1, H1)
    b2 = params["b2"].astype(jnp.float32).reshape(1, H2)
    b3 = params["b3"].astype(jnp.float32).reshape(1, H3)

    B, F = x.shape
    budget, vmem_limit, two_cores = _vmem_plan()
    tb, tk, nk, mask_tail = _pick_tiles(
        B, F, budget, two_cores, x.dtype.itemsize, mm_dtype.itemsize, max_block_b)
    nb = pl.cdiv(B, tb)

    # Constant-index blocks get a single buffer (double-buffering them is pure
    # VMEM waste). w1 keeps the default 2 buffers only when it streams over K.
    resident = dict(pipeline_mode=pl.Buffered(1))

    if nk == 1:
        kernel = functools.partial(_mlp_kernel_fused, matmul_dtype=mm_dtype)
        grid_spec = pltpu.PrefetchScalarGridSpec(
            num_scalar_prefetch=0,
            grid=(nb,),
            in_specs=[
                pl.BlockSpec((tb, F), lambda i: (i, 0)),                 # x tile
                pl.BlockSpec((F, H1), lambda i: (0, 0), **resident),     # w1
                pl.BlockSpec((1, H1), lambda i: (0, 0), **resident),     # b1
                pl.BlockSpec((H1, H2), lambda i: (0, 0), **resident),    # w2
                pl.BlockSpec((1, H2), lambda i: (0, 0), **resident),     # b2
                pl.BlockSpec((H2, H3), lambda i: (0, 0), **resident),    # w3
                pl.BlockSpec((1, H3), lambda i: (0, 0), **resident),     # b3
            ],
            out_specs=pl.BlockSpec((tb, H3), lambda i: (i, 0)),
            scratch_shapes=[],
        )
        dims = ("parallel",)
    else:
        kernel = functools.partial(_mlp_kernel_ktiled, matmul_dtype=mm_dtype,
                                   f_total=F, tk=tk, mask_tail=mask_tail)
        grid_spec = pltpu.PrefetchScalarGridSpec(
            num_scalar_prefetch=0,
            grid=(nb, nk),
            in_specs=[
                pl.BlockSpec((tb, tk), lambda i, k: (i, k)),             # x tile
                # TODO(synk): sweep pipeline_mode=pl.Buffered(3) on x/w1 if the
                # bundle shows exposed DMA waits at K-tile boundaries.
                pl.BlockSpec((tk, H1), lambda i, k: (k, 0)),             # w1 slice
                pl.BlockSpec((1, H1), lambda i, k: (0, 0), **resident),  # b1
                pl.BlockSpec((H1, H2), lambda i, k: (0, 0), **resident), # w2
                pl.BlockSpec((1, H2), lambda i, k: (0, 0), **resident),  # b2
                pl.BlockSpec((H2, H3), lambda i, k: (0, 0), **resident), # w3
                pl.BlockSpec((1, H3), lambda i, k: (0, 0), **resident),  # b3
            ],
            out_specs=pl.BlockSpec((tb, H3), lambda i, k: (i, 0)),
            scratch_shapes=[pltpu.VMEM((tb, H1), jnp.float32)],          # layer-1 acc
        )
        dims = ("parallel", "arbitrary")

    out = pl.pallas_call(
        kernel,
        out_shape=jax.ShapeDtypeStruct((B, H3), jnp.float32),
        grid_spec=grid_spec,
        compiler_params=pltpu.CompilerParams(
            dimension_semantics=dims,
            vmem_limit_bytes=vmem_limit,
        ),
    )(x, w1, b1, w2, b2, w3, b3)
    return out


def prepare_params(params, matmul_dtype=jnp.bfloat16):
    """One-time cast of the weight matrices to the MXU dtype (biases stay f32).

    Call once outside the hot loop so the kernel never pays per-call casts and
    w1 is re-streamed from HBM at half width when K-tiled.
    """
    out = dict(params)
    for name in ("w1", "w2", "w3"):
        out[name] = params[name].astype(matmul_dtype)
    return out


def init_params(key, feature_len):
    """Deterministic init mimicking nn.Linear defaults (uniform +-1/sqrt(fan_in)).

    Weights are stored (in, out), i.e. already transposed relative to PyTorch.
    """
    dims = [(feature_len, H1), (H1, H2), (H2, H3)]
    params = {}
    keys = jax.random.split(key, 2 * len(dims))
    for idx, (fan_in, fan_out) in enumerate(dims):
        bound = 1.0 / jnp.sqrt(float(fan_in))
        w = jax.random.uniform(keys[2 * idx], (fan_in, fan_out),
                               minval=-bound, maxval=bound, dtype=jnp.float32)
        b = jax.random.uniform(keys[2 * idx + 1], (1, fan_out),
                               minval=-bound, maxval=bound, dtype=jnp.float32)
        params[f"w{idx + 1}"] = w
        params[f"b{idx + 1}"] = b
    return params


def _reference(x, p):
    h = jnp.maximum(x @ p["w1"] + p["b1"], 0.0)
    h = jnp.maximum(h @ p["w2"] + p["b2"], 0.0)
    h = jnp.maximum(h @ p["w3"] + p["b3"], 0.0)
    return h


if __name__ == "__main__":
    key = jax.random.PRNGKey(0)
    k_x, k_p = jax.random.split(key)

    batch, feature_len = 2, 32
    x = jax.random.normal(k_x, (batch, feature_len), dtype=jnp.float32)
    params = init_params(k_p, feature_len)

    ref = _reference(x, params)

    # f32 MXU path: tight check against the pure-JAX reference.
    out_f32 = full_connected_layer(x, params, matmul_dtype=jnp.float32)
    out_f32 = jax.block_until_ready(out_f32)
    assert out_f32.shape == (batch, H3), out_f32.shape
    assert jnp.allclose(out_f32, ref, atol=1e-5, rtol=1e-5), "f32 mismatch vs reference"

    # Default bf16-MXU / f32-accumulate path with pre-converted bf16 weights.
    params_bf16 = prepare_params(params, jnp.bfloat16)
    out_bf16 = full_connected_layer(x, params_bf16)
    out_bf16 = jax.block_until_ready(out_bf16)
    assert out_bf16.shape == (batch, H3), out_bf16.shape
    assert jnp.allclose(out_bf16, ref, atol=2e-2, rtol=2e-2), "bf16 mismatch vs reference"

    print("KERNEL_OK")
</pallas_src>

<mosaic_0001>
module attributes {stable_mosaic.version = 11 : i64} {
  func.func @_mlp_kernel_fused(%arg0: i32, %arg1: memref<8x32xf32, #tpu.memory_space<vmem>>, %arg2: memref<32x256xf32, #tpu.memory_space<vmem>>, %arg3: memref<1x256xf32, #tpu.memory_space<vmem>>, %arg4: memref<256x128xf32, #tpu.memory_space<vmem>>, %arg5: memref<1x128xf32, #tpu.memory_space<vmem>>, %arg6: memref<128x64xf32, #tpu.memory_space<vmem>>, %arg7: memref<1x64xf32, #tpu.memory_space<vmem>>, %arg8: memref<8x64xf32, #tpu.memory_space<vmem>>) attributes {dimension_semantics = [#tpu.dimension_semantics<parallel>], iteration_bounds = array<i64: 1>, scalar_prefetch = 0 : i64, scratch_operands = 0 : i64, tpu.core_type = #tpu.core_type<tc>, window_params = [{transform_indices = @transform_0, window_bounds = array<i64: 8, 32>}, {pipeline_mode = #tpu.pipeline_mode<synchronous>, transform_indices = @transform_1, window_bounds = array<i64: 32, 256>}, {pipeline_mode = #tpu.pipeline_mode<synchronous>, transform_indices = @transform_2, window_bounds = array<i64: 1, 256>}, {pipeline_mode = #tpu.pipeline_mode<synchronous>, transform_indices = @transform_3, window_bounds = array<i64: 256, 128>}, {pipeline_mode = #tpu.pipeline_mode<synchronous>, transform_indices = @transform_4, window_bounds = array<i64: 1, 128>}, {pipeline_mode = #tpu.pipeline_mode<synchronous>, transform_indices = @transform_5, window_bounds = array<i64: 128, 64>}, {pipeline_mode = #tpu.pipeline_mode<synchronous>, transform_indices = @transform_6, window_bounds = array<i64: 1, 64>}, {transform_indices = @transform_7, window_bounds = array<i64: 8, 64>}]} {
    %c0 = arith.constant 0 : index
    %c0_0 = arith.constant 0 : index
    %0 = vector.load %arg1[%c0, %c0_0] : memref<8x32xf32, #tpu.memory_space<vmem>>, vector<8x32xf32>
    %c0_1 = arith.constant 0 : index
    %c0_2 = arith.constant 0 : index
    %1 = vector.load %arg2[%c0_1, %c0_2] : memref<32x256xf32, #tpu.memory_space<vmem>>, vector<32x256xf32>
    %c0_3 = arith.constant 0 : index
    %c0_4 = arith.constant 0 : index
    %2 = vector.load %arg4[%c0_3, %c0_4] : memref<256x128xf32, #tpu.memory_space<vmem>>, vector<256x128xf32>
    %c0_5 = arith.constant 0 : index
    %c0_6 = arith.constant 0 : index
    %3 = vector.load %arg6[%c0_5, %c0_6] : memref<128x64xf32, #tpu.memory_space<vmem>>, vector<128x64xf32>
    %cst = arith.constant dense<0.000000e+00> : vector<8x256xf32>
    %4 = tpu.matmul %0, %1, %cst {dimension_numbers = #tpu.dot_dimension_numbers<[1], [0], [0], [1], [0, 0, 1, 1], [], []>} : vector<8x32xf32>, vector<32x256xf32>, vector<8x256xf32> -> vector<8x256xf32>
    %c0_7 = arith.constant 0 : index
    %c0_8 = arith.constant 0 : index
    %5 = vector.load %arg3[%c0_7, %c0_8] : memref<1x256xf32, #tpu.memory_space<vmem>>, vector<1x256xf32>
    %6 = vector.broadcast %5 : vector<1x256xf32> to vector<8x256xf32>
    %7 = arith.addf %4, %6 : vector<8x256xf32>
    %cst_9 = arith.constant 0.000000e+00 : f32
    %8 = vector.broadcast %cst_9 : f32 to vector<8x256xf32>
    %9 = arith.maximumf %7, %8 : vector<8x256xf32>
    %cst_10 = arith.constant dense<0.000000e+00> : vector<8x128xf32>
    %10 = tpu.matmul %9, %2, %cst_10 {dimension_numbers = #tpu.dot_dimension_numbers<[1], [0], [0], [1], [0, 0, 1, 1], [], []>} : vector<8x256xf32>, vector<256x128xf32>, vector<8x128xf32> -> vector<8x128xf32>
    %c0_11 = arith.constant 0 : index
    %c0_12 = arith.constant 0 : index
    %11 = vector.load %arg5[%c0_11, %c0_12] : memref<1x128xf32, #tpu.memory_space<vmem>>, vector<1x128xf32>
    %12 = vector.broadcast %11 : vector<1x128xf32> to vector<8x128xf32>
    %13 = arith.addf %10, %12 : vector<8x128xf32>
    %cst_13 = arith.constant 0.000000e+00 : f32
    %14 = vector.broadcast %cst_13 : f32 to vector<8x128xf32>
    %15 = arith.maximumf %13, %14 : vector<8x128xf32>
    %cst_14 = arith.constant dense<0.000000e+00> : vector<8x64xf32>
    %16 = tpu.matmul %15, %3, %cst_14 {dimension_numbers = #tpu.dot_dimension_numbers<[1], [0], [0], [1], [0, 0, 1, 1], [], []>} : vector<8x128xf32>, vector<128x64xf32>, vector<8x64xf32> -> vector<8x64xf32>
    %c0_15 = arith.constant 0 : index
    %c0_16 = arith.constant 0 : index
    %17 = vector.load %arg7[%c0_15, %c0_16] : memref<1x64xf32, #tpu.memory_space<vmem>>, vector<1x64xf32>
    %18 = vector.broadcast %17 : vector<1x64xf32> to vector<8x64xf32>
    %19 = arith.addf %16, %18 : vector<8x64xf32>
    %cst_17 = arith.constant 0.000000e+00 : f32
    %20 = vector.broadcast %cst_17 : f32 to vector<8x64xf32>
    %21 = arith.maximumf %19, %20 : vector<8x64xf32>
    %c0_18 = arith.constant 0 : index
    %c0_19 = arith.constant 0 : index
    %22 = vector.load %arg8[%c0_18, %c0_19] : memref<8x64xf32, #tpu.memory_space<vmem>>, vector<8x64xf32>
    tpu.vector_store %arg8[%c0_18, %c0_19], %21 {strides = array<i32>} : memref<8x64xf32, #tpu.memory_space<vmem>>, vector<8x64xf32>,
    return
  }
  func.func @transform_0(%arg0: i32) -> (i32, i32) {
    %c0_i32 = arith.constant 0 : i32
    %c0_i32_0 = arith.constant 0 : i32
    return %arg0, %c0_i32 : i32, i32
  }
  func.func @transform_1(%arg0: i32) -> (i32, i32) {
    %c0_i32 = arith.constant 0 : i32
    %c0_i32_0 = arith.constant 0 : i32
    %c0_i32_1 = arith.constant 0 : i32
    return %c0_i32, %c0_i32_0 : i32, i32
  }
  func.func @transform_2(%arg0: i32) -> (i32, i32) {
    %c0_i32 = arith.constant 0 : i32
    %c0_i32_0 = arith.constant 0 : i32
    %c0_i32_1 = arith.constant 0 : i32
    return %c0_i32, %c0_i32_0 : i32, i32
  }
  func.func @transform_3(%arg0: i32) -> (i32, i32) {
    %c0_i32 = arith.constant 0 : i32
    %c0_i32_0 = arith.constant 0 : i32
    %c0_i32_1 = arith.constant 0 : i32
    return %c0_i32, %c0_i32_0 : i32, i32
  }
  func.func @transform_4(%arg0: i32) -> (i32, i32) {
    %c0_i32 = arith.constant 0 : i32
    %c0_i32_0 = arith.constant 0 : i32
    %c0_i32_1 = arith.constant 0 : i32
    return %c0_i32, %c0_i32_0 : i32, i32
  }
  func.func @transform_5(%arg0: i32) -> (i32, i32) {
    %c0_i32 = arith.constant 0 : i32
    %c0_i32_0 = arith.constant 0 : i32
    %c0_i32_1 = arith.constant 0 : i32
    return %c0_i32, %c0_i32_0 : i32, i32
  }
  func.func @transform_6(%arg0: i32) -> (i32, i32) {
    %c0_i32 = arith.constant 0 : i32
    %c0_i32_0 = arith.constant 0 : i32
    %c0_i32_1 = arith.constant 0 : i32
    return %c0_i32, %c0_i32_0 : i32, i32
  }
  func.func @transform_7(%arg0: i32) -> (i32, i32) {
    %c0_i32 = arith.constant 0 : i32
    %c0_i32_0 = arith.constant 0 : i32
    return %arg0, %c0_i32 : i32, i32
  }
}

</mosaic_0001>

<bundles_post_ra>
// kernel: full_connected_layer.1
= control target key start
LH: loop header
LB: loop body
LE: loop exit
PB: predicated region body
PF: predicated region fallthrough
CT: control target
= control target key end

     0   :  { %12 = vsyncpa [#allocation3], 0  ;;  %s732_s0 = inlined_call_operand.vmem [shape: f32[2,32], index: 0, kind: input, shape index: {}]   ;;  %s733_s1 = inlined_call_operand.vmem [shape: f32[32,256], index: 1, kind: input, shape index: {}]   ;;  %s734_s2 = inlined_call_operand.vmem [shape: f32[1,256], index: 2, kind: input, shape index: {}]   ;;  %s735_s3 = inlined_call_operand.hbm [shape: f32[256,128], index: 3, kind: input, shape index: {}]   ;;  %s736_s4 = inlined_call_operand.vmem [shape: f32[1,128], index: 4, kind: input, shape index: {}]   ;;  %s737_s5 = inlined_call_operand.vmem [shape: f32[128,64], index: 5, kind: input, shape index: {}]   ;;  %s738_s6 = inlined_call_operand.vmem [shape: f32[1,64], index: 6, kind: input, shape index: {}]   ;;  %s739_s7 = inlined_call_operand.hbm [shape: f32[2,64], index: 7, kind: output, shape index: {}]  }
   0x1   :  { %13 = vsyncpa [#allocation4], 0  ;;  %s573_s24 = smov [#allocation2]   ;;  %s525_s28 = scalar_lea.hbm %s735_s3, 4096 }
   0x2   :  { %s25_s25 = sshll.u32 %s573_s24, 4  ;;  %p526_p0 = scmp.ne.s32.totalorder %s735_s3, %s525_s28  ;;  %s26_s25 = int_to_ptr.vmem [resolvable:$true] %s25_s25 }
   0x3   :  { %p529_p1 = scmp.lt.u32.totalorder %s525_s28, %s735_s3 }
   0x5   :  { %p531_p2 = pnand %p529_p1, %p526_p0 }
   0x7   :  { %534 = shalt.err (!%p531_p2)
}
   0x8   :  { %s535_s10 = scalar_lea.vmem %s26_s25, 4096  ;;  %p540_p4 = scmp.lt.s32.totalorder %s26_s25, %s26_s25 }
   0x9   :  { %p536_p3 = scmp.ne.s32.totalorder %s26_s25, %s535_s10  ;;  %p541_p5 = scmp.lt.s32.totalorder %s535_s10, %s535_s10 }
   0xb   :  { %p542_p6 = por %p541_p5, %p540_p4 }
   0xd   :  { %p543_p7 = pnand %p542_p6, %p536_p3 }
   0xf   :  { %546 = shalt.err (!%p543_p7)
}
  0x10   :  { %s574_s11 = smov 128   ;;  %s575_s12 = smov 8  }
  0x11   :  { %31 = dma.hbm_to_vmem [thread:$0]  %s735_s3, 4096, %s26_s25, [#allocation3], %s574_s11, %s574_s11, %s575_s12  }
  0x12   :  { %569 = dma.done.wait [#allocation3], 4096  }
  0x13   :  { %570 = vsyncadd [#allocation3], 4294963200  ;;  %v576_v0 = vmov 0.0   ;;  %v43_v1 = vld [vmem:[%s733_s1 + $0x8] sm:$0xff]  ;;  %v45_v2 = vld [vmem:[%s733_s1 + $0x18] sm:$0xff]  ;;  %vm110_vm0 = vcmask 261120  }
  0x14   :  { %178 = vmatprep.mubr.f32.mxu0 %v576_v0  ;;  %v42_v3 = vld [vmem:[%s733_s1] sm:$0xff]  ;;  %v452_v4 = vpack.c.bf16 %v45_v2, %v43_v1  ;;  %v44_v5 = vld [vmem:[%s733_s1 + $0x10] sm:$0xff]  ;;  %v47_v6 = vld [vmem:[%s733_s1 + $0x28] sm:$0xff]  ;;  %v577_v2 = vmov 0.0|0.0   ;;  %vm578_vm1 = vmmov 0   ;;  %vm343_vm2 = vcmask 523264  }
  0x15   :  { %v49_v7 = vld [vmem:[%s733_s1 + $0x38] sm:$0xff]  ;;  %v454_v8 = vpack.c.bf16 %v44_v5, %v42_v3  ;;  %v46_v10 = vld [vmem:[%s733_s1 + $0x20] sm:$0xff]  ;;  %v48_v11 = vld [vmem:[%s733_s1 + $0x30] sm:$0xff] }
  0x16   :  { %v456_v9 = vpack.c.bf16 %v49_v7, %v47_v6  ;;  %453 = vmatprep.subr.bf16.mxu0 %v452_v4  ;;  %v66_v12 = vld [vmem:[#allocation2 + $0x80] sm:$0xff]  ;;  %v67_v13 = vld [vmem:[#allocation2 + $0x88] sm:$0xff]  ;;  %v458_v15 = vpack.c.bf16 %v48_v11, %v46_v10  ;;  %v68_v18 = vld [vmem:[#allocation2 + $0x90] sm:$0xff] }
  0x17   :  { %v50_v14 = vld [vmem:[#allocation2] sm:$0xff]  ;;  %455 = vmatpush1.bf16.msra.mxu0 %v454_v8  ;;  %v460_v16 = vpack.c.bf16 %v67_v13, %v66_v12  ;;  %v51_v17 = vld [vmem:[#allocation2 + $0x8] sm:$0xff]  ;;  %v69_v19 = vld [vmem:[#allocation2 + $0x98] sm:$0xff] }
  0x18   :  { %457 = vmatprep.subr.bf16.mxu0 %v456_v9  ;;  %v462_v20 = vpack.c.bf16 %v51_v17, %v50_v14  ;;  %v464_v21 = vpack.c.bf16 %v69_v19, %v68_v18  ;;  %v52_v22 = vld [vmem:[#allocation2 + $0x10] sm:$0xff]  ;;  %v53_v23 = vld [vmem:[#allocation2 + $0x18] sm:$0xff]  ;;  %v70_v24 = vld [vmem:[#allocation2 + $0xa0] sm:$0xff]  ;;  %v100_v18 = vlaneseq }
  0x19   :  { %461 = vmatprep.subr.bf16.mxu1 %v460_v16  ;;  %v71_v25 = vld [vmem:[#allocation2 + $0xa8] sm:$0xff]  ;;  %v466_v26 = vpack.c.bf16 %v53_v23, %v52_v22  ;;  %v41_v27 = vld [vmem:[%s732_s0] sm:$0xff]  ;;  %v72_v31 = vld [vmem:[#allocation2 + $0xb0] sm:$0xff] }
  0x1a   :  { %463 = vmatpush3.bf16.msra.mxu1 %v462_v20  ;;  %v468_v28 = vpack.c.bf16 %v71_v25, %v70_v24  ;;  %v54_v29 = vld [vmem:[#allocation2 + $0x20] sm:$0xff]  ;;  %v55_v30 = vld [vmem:[#allocation2 + $0x28] sm:$0xff]  ;;  %v73_v32 = vld [vmem:[#allocation2 + $0xb8] sm:$0xff]  ;;  %v101_v19 = vshrl.u32 %v100_v18, 7 }
  0x1b   :  { %459 = vmatpush1.bf16.msra.mxu0 %v458_v15  ;;  %465 = vmatprep.subr.bf16.mxu1 %v464_v21  ;;  %v470_v33 = vpack.c.bf16 %v55_v30, %v54_v29  ;;  %v472_v34 = vpack.c.bf16 %v73_v32, %v72_v31  ;;  %v56_v35 = vld [vmem:[#allocation2 + $0x30] sm:$0xff]  ;;  %v57_v36 = vld [vmem:[#allocation2 + $0x38] sm:$0xff]  ;;  %v74_v37 = vld [vmem:[#allocation2 + $0xc0] sm:$0xff] }
  0x1c   :  { %v75_v38 = vld [vmem:[#allocation2 + $0xc8] sm:$0xff]  ;;  %v474_v39 = vpack.c.bf16 %v57_v36, %v56_v35  ;;  %v58_v41 = vld [vmem:[#allocation2 + $0x40] sm:$0xff]  ;;  %v76_v43 = vld [vmem:[#allocation2 + $0xd0] sm:$0xff]  ;;  %492 = vmatprep.subr.bf16.mxu0 %v577_v2  ;;  %v102_v20 = vsub.s32 0, %v101_v19  ;;  %v106_v22 = vsub.s32 1, %v101_v19 }
  0x1d   :  { %v476_v40 = vpack.c.bf16 %v75_v38, %v74_v37  ;;  %v59_v42 = vld [vmem:[#allocation2 + $0x48] sm:$0xff]  ;;  %v77_v44 = vld [vmem:[#allocation2 + $0xd8] sm:$0xff]  ;;  %v60_v47 = vld [vmem:[#allocation2 + $0x50] sm:$0xff] }
  0x1e   :  { %362 = vmatmul.mubr.msk.f32.vlgmr.msra.gmra.mrb[0].mxu0 %vm110_vm0, %v41_v27  ;;  %467 = vmatpush3.bf16.msra.mxu1 %v466_v26  ;;  %v478_v45 = vpack.c.bf16 %v59_v42, %v58_v41  ;;  %v480_v46 = vpack.c.bf16 %v77_v44, %v76_v43  ;;  %v61_v48 = vld [vmem:[#allocation2 + $0x58] sm:$0xff]  ;;  %v78_v49 = vld [vmem:[#allocation2 + $0xe0] sm:$0xff]  ;;  %v79_v50 = vld [vmem:[#allocation2 + $0xe8] sm:$0xff] }
  0x1f   :  { %469 = vmatprep.subr.bf16.mxu1 %v468_v28  ;;  %v482_v51 = vpack.c.bf16 %v61_v48, %v60_v47  ;;  %v484_v52 = vpack.c.bf16 %v79_v50, %v78_v49  ;;  %v62_v53 = vld [vmem:[#allocation2 + $0x60] sm:$0xff]  ;;  %v63_v54 = vld [vmem:[#allocation2 + $0x68] sm:$0xff]  ;;  %v80_v56 = vld [vmem:[#allocation2 + $0xf0] sm:$0xff]  ;;  %449 = vmatprep.mubr.msk.f32.mxu0 %vm578_vm1, %v576_v0 }
  0x20   :  { %v486_v55 = vpack.c.bf16 %v63_v54, %v62_v53  ;;  %v81_v57 = vld [vmem:[#allocation2 + $0xf8] sm:$0xff]  ;;  %v64_v59 = vld [vmem:[#allocation2 + $0x70] sm:$0xff]  ;;  %v82_v62 = vld [vmem:[%s737_s5] sm:$0xff] }
  0x21   :  { %v488_v58 = vpack.c.bf16 %v81_v57, %v80_v56  ;;  %v65_v60 = vld [vmem:[#allocation2 + $0x78] sm:$0xff]  ;;  %v83_v63 = vld [vmem:[%s737_s5 + $0x8] sm:$0xff]  ;;  %v84_v1 = vld [vmem:[%s737_s5 + $0x10] sm:$0xff] }
  0x22   :  { %471 = vmatpush3.bf16.msra.mxu1 %v470_v33  ;;  %v490_v61 = vpack.c.bf16 %v65_v60, %v64_v59  ;;  %v493_v3 = vpack.c.bf16 %v83_v63, %v82_v62  ;;  %v85_v4 = vld [vmem:[%s737_s5 + $0x18] sm:$0xff]  ;;  %v86_v6 = vld [vmem:[%s737_s5 + $0x20] sm:$0xff]  ;;  %v87_v7 = vld [vmem:[%s737_s5 + $0x28] sm:$0xff] }
  0x23   :  { %473 = vmatprep.subr.bf16.mxu1 %v472_v34  ;;  %v496_v5 = vpack.c.bf16 %v85_v4, %v84_v1  ;;  %v499_v8 = vpack.c.bf16 %v87_v7, %v86_v6  ;;  %v88_v9 = vld [vmem:[%s737_s5 + $0x30] sm:$0xff]  ;;  %v89_v10 = vld [vmem:[%s737_s5 + $0x38] sm:$0xff]  ;;  %v90_v12 = vld [vmem:[%s737_s5 + $0x40] sm:$0xff] }
  0x24   :  { %494 = vmatpush3.bf16.msra.mxu0 %v493_v3  ;;  %v502_v11 = vpack.c.bf16 %v89_v10, %v88_v9  ;;  %v91_v13 = vld [vmem:[%s737_s5 + $0x48] sm:$0xff]  ;;  %v92_v15 = vld [vmem:[%s737_s5 + $0x50] sm:$0xff]  ;;  %v93_v16 = vld [vmem:[%s737_s5 + $0x58] sm:$0xff] }
  0x25   :  { %495 = vmatprep.subr.bf16.mxu0 %v577_v2  ;;  %v505_v14 = vpack.c.bf16 %v91_v13, %v90_v12  ;;  %v508_v17 = vpack.c.bf16 %v93_v16, %v92_v15  ;;  %v98_v21 = vld [vmem:[%s734_s2] sm:$0x3]  ;;  %v95_v32 = vld [vmem:[%s737_s5 + $0x68] sm:$0xff]  ;;  %v96_v34 = vld [vmem:[%s737_s5 + $0x70] sm:$0xff] }
  0x26   :  { %475 = vmatpush3.bf16.msra.mxu1 %v474_v39  ;;  %v103_v23 = vrot.slane %v98_v21, %v102_v20  ;;  %v107_v24 = vrot.slane %v98_v21, %v106_v22  ;;  %v94_v31 = vld [vmem:[%s737_s5 + $0x60] sm:$0xff]  ;;  %v97_v35 = vld [vmem:[%s737_s5 + $0x78] sm:$0xff] }
  0x27   :  { %477 = vmatprep.subr.bf16.mxu1 %v476_v40  ;;  %v511_v33 = vpack.c.bf16 %v95_v32, %v94_v31  ;;  %v514_v36 = vpack.c.bf16 %v97_v35, %v96_v34  ;;  %v363_v38 = vld [vmem:[%s736_s4] ss:$0 sm:$0xff] }
  0x28   :  { %497 = vmatpush3.bf16.msra.mxu0 %v496_v5  ;;  %v364_v43 = vld [vmem:[%s738_s6] ss:$0 sm:$0xff] }
  0x29   :  { %498 = vmatprep.subr.bf16.mxu0 %v577_v2 }
  0x2a   :  { %479 = vmatpush3.bf16.msra.mxu1 %v478_v45 }
  0x2b   :  { %481 = vmatprep.subr.bf16.mxu1 %v480_v46 }
  0x2c   :  { %500 = vmatpush3.bf16.msra.mxu0 %v499_v8 }
  0x2d   :  { %501 = vmatprep.subr.bf16.mxu0 %v577_v2 }
  0x2e   :  { %483 = vmatpush3.bf16.msra.mxu1 %v482_v51 }
  0x2f   :  { %485 = vmatprep.subr.bf16.mxu1 %v484_v52 }
  0x30   :  { %503 = vmatpush3.bf16.msra.mxu0 %v502_v11 }
  0x31   :  { %504 = vmatprep.subr.bf16.mxu0 %v577_v2 }
  0x32   :  { %487 = vmatpush3.bf16.msra.mxu1 %v486_v55 }
  0x33   :  { %489 = vmatprep.subr.bf16.mxu1 %v488_v58 }
  0x34   :  { %506 = vmatpush3.bf16.msra.mxu0 %v505_v14 }
  0x35   :  { %507 = vmatprep.subr.bf16.mxu0 %v577_v2 }
  0x36   :  { %491 = vmatpush3.bf16.msra.mxu1 %v490_v61 }
  0x38   :  { %509 = vmatpush3.bf16.msra.mxu0 %v508_v17 }
  0x39   :  { %510 = vmatprep.subr.bf16.mxu0 %v577_v2 }
  0x3c   :  { %512 = vmatpush3.bf16.msra.mxu0 %v511_v33 }
  0x3d   :  { %513 = vmatprep.subr.bf16.mxu0 %v577_v2 }
  0x40   :  { %515 = vmatpush3.bf16.msra.mxu0 %v514_v36 }
  0xf1   :  { %v180_v25 = vpop.f32.mrb[0].mxu0 }
  0xf2   :  { %v181_v26 = vadd.f32 %v180_v25, %v103_v23  ;;  %v182_v27 = vpop.f32.mrb[1].mxu0 }
  0xf3   :  { %v183_v28 = vadd.f32 %v182_v27, %v107_v24 }
  0xf4   :  { %v185_v30 = vmax.f32 %v181_v26, 0.0 }
  0xf5   :  { %v186_v29 = vmax.f32 %v183_v28, 0.0 }
  0xf7   :  { %258 = vmatprep.mubr.f32.mxu1 %v186_v29 }
  0xf8   :  { %259 = vmatmul.mubr.f32.vlgmr.msra.gmra.mrb[0].mxu1 %v185_v30 }
 0x1cb   :  { %v397_v37 = vpop.f32.mrb[0].mxu1 }
 0x1cc   :  { %v398_v39 = vpop.f32.mrb[1].mxu1 }
 0x1cd   :  { %v399_v40 = vadd.f32 %v398_v39, %v397_v37 }
 0x1cf   :  { %v261_v41 = vadd.f32 %v399_v40, %v363_v38 }
 0x1d1   :  { %v264_v42 = vmax.f32 %v261_v41, 0.0 }
 0x1d3   :  { %450 = vmatmul.mubr.f32.vlgmr.msra.gmra.mrb[2].mxu0 %v264_v42 }
 0x2a6   :  { %v338_v44 = vpop.f32.mrb[2].mxu0 }
 0x2a7   :  { %v339_v45 = vadd.f32 %v364_v43, %v338_v44  ;;  %v451_v46 = vpop.f32.mrb[3].mxu0 }
 0x2a9   :  { %v342_v47 = vmax.f32 %v339_v45, 0.0 }
 0x2ab   :  { %344 = vst.msk [vmem:[#allocation5] sm:$0xff] %vm343_vm2, %v342_v47 }
 0x2ac   :  { %349 = vsyncadd [#allocation4], 96  ;;  %s579_s5 = smov [#allocation5]  }
 0x2ad   :  { %s350_s18 = sshll.u32 %s579_s5, 4  ;;  %s351_s18 = int_to_ptr.vmem [resolvable:$true] %s350_s18 }
 0x2ae   :  { %s547_s4 = scalar_lea.vmem %s351_s18, 32  ;;  %s551_s19 = scalar_lea.vmem %s351_s18, 128 }
 0x2af   :  { %p548_p8 = scmp.ne.s32.totalorder %s351_s18, %s547_s4  ;;  %p552_p9 = scmp.lt.s32.totalorder %s351_s18, %s351_s18 }
 0x2b0   :  { %p553_p10 = scmp.lt.s32.totalorder %s551_s19, %s547_s4 }
 0x2b2   :  { %p554_p11 = por %p553_p10, %p552_p9 }
 0x2b4   :  { %p555_p12 = pnand %p554_p11, %p548_p8 }
 0x2b6   :  { %558 = shalt.err (!%p555_p12)
}
 0x2b7   :  { %s559_s21 = scalar_lea.hbm %s739_s7, 32 }
 0x2b8   :  { %p560_p13 = scmp.ne.s32.totalorder %s739_s7, %s559_s21  ;;  %p563_p0 = scmp.lt.u32.totalorder %s559_s21, %s739_s7 }
 0x2ba   :  { %p565_p1 = pnand %p563_p0, %p560_p13 }
 0x2bc   :  { %568 = shalt.err (!%p565_p1)
}
 0x2bd   :  { %s580_s25 = smov 32   ;;  %s581_s26 = smov 2  }
 0x2be   :  { %356 = dma.vmem_to_hbm [thread:$0]  %s351_s18, 32, %s739_s7, [#allocation4], %s580_s25, %s580_s25, %s581_s26  }
 0x2bf   :  { %571 = dma.done.wait [#allocation4], 128  }
 0x2c0   :  { %572 = vsyncadd [#allocation4], 4294967168 }
 0x2c1   :  { %360 = vsyncpa [#allocation3], 1 }
 0x2c2   :  { %361 = vsyncpa [#allocation4], 1 }

</bundles_post_ra>
